<compile_context>
chip_gen: v7x
topology: tpu7x:2x2x1
jax: 0.10.0
libtpu: 0.0.40
codegen_flags: <defaults>
</compile_context>

<pallas_src>
import math
import functools

import jax
import jax.numpy as jnp
from jax.experimental import pallas as pl
from jax.experimental.pallas import tpu as pltpu


def _pe_add_kernel(x_ref, pe_ref, o_ref, *, batch, d_model):
    # x/o tiles: (TS, B*D); pe tile: (TS, D).
    # Broadcast pe across the batch by adding it to each D-wide lane slab
    # (static Python loop -> unrolled, lane-aligned slices when D % 128 == 0).
    pe_t = pe_ref[...]
    for b in range(batch):
        sl = slice(b * d_model, (b + 1) * d_model)
        o_ref[:, sl] = (x_ref[:, sl] + pe_t).astype(o_ref.dtype)


def _pe_add_dropout_kernel(x_ref, pe_ref, u_ref, o_ref, *, batch, d_model, p):
    # Inverted dropout: keep w.p. (1-p) and scale survivors by 1/(1-p),
    # exactly like torch.nn.Dropout (mask bit-pattern differs from torch RNG).
    pe_t = pe_ref[...]
    scale = 1.0 / (1.0 - p)
    for b in range(batch):
        sl = slice(b * d_model, (b + 1) * d_model)
        y = (x_ref[:, sl] + pe_t) * scale
        keep = u_ref[:, sl] >= p
        o_ref[:, sl] = jnp.where(keep, y, jnp.zeros_like(y)).astype(o_ref.dtype)


def make_positional_encoding(d_model, max_len=100):
    """Deterministic sin/cos table, identical to the PyTorch __init__."""
    position = jnp.arange(max_len, dtype=jnp.float32)[:, None]           # (L, 1)
    div_term = jnp.exp(
        jnp.arange(0, d_model, 2, dtype=jnp.float32)
        * (-math.log(10000.0) / d_model)
    )                                                                     # (D/2,)
    pe = jnp.zeros((max_len, d_model), jnp.float32)
    pe = pe.at[:, 0::2].set(jnp.sin(position * div_term))
    pe = pe.at[:, 1::2].set(jnp.cos(position * div_term))
    return pe                                                             # (L, D)


def _choose_seq_tile(seq_len, row_bytes, vmem_budget=2 * 1024 * 1024):
    """Pick a sequence tile so each VMEM buffer is ~<=2 MiB (v7x-safe) and the
    block's sublane dim is either a multiple of 8 or the full sequence."""
    ts = min(seq_len, max(8, vmem_budget // max(row_bytes, 1)))
    if ts >= seq_len:
        return seq_len
    return max(8, (ts // 8) * 8)


def positional_encoding_forward(x, pe, *, p=0.1, training=False, rng_key=None):
    """x: (S, B, D); pe: (max_len, D) from make_positional_encoding."""
    S, B, D = x.shape
    pe_s = pe[:S].astype(x.dtype)                                         # (S, D)

    # Free, contiguous view: (S, B, D) -> (S, B*D). Makes the kernel blocks
    # lane/sublane dense even when B is tiny (e.g. B=2).
    x2 = x.reshape(S, B * D)

    itemsize = jnp.dtype(x.dtype).itemsize
    ts = _choose_seq_tile(S, B * D * itemsize)
    grid = (pl.cdiv(S, ts),)

    x_spec = pl.BlockSpec((ts, B * D), lambda i: (i, 0))
    u_spec = pl.BlockSpec((ts, B * D), lambda i: (i, 0))
    pe_spec = pl.BlockSpec((ts, D), lambda i: (i, 0))
    out_shape = jax.ShapeDtypeStruct((S, B * D), x.dtype)
    cparams = pltpu.CompilerParams(dimension_semantics=("parallel",))

    if (not training) or p == 0.0:
        out2 = pl.pallas_call(
            functools.partial(_pe_add_kernel, batch=B, d_model=D),
            grid=grid,
            in_specs=[x_spec, pe_spec],
            out_specs=x_spec,
            out_shape=out_shape,
            compiler_params=cparams,
        )(x2, pe_s)
        return out2.reshape(S, B, D)

    if p >= 1.0:
        # nn.Dropout(p=1.0) zeroes everything.
        return jnp.zeros_like(x)

    if rng_key is None:
        rng_key = jax.random.PRNGKey(0)
    u = jax.random.uniform(rng_key, (S, B * D), dtype=jnp.float32)

    out2 = pl.pallas_call(
        functools.partial(_pe_add_dropout_kernel, batch=B, d_model=D, p=p),
        grid=grid,
        in_specs=[x_spec, pe_spec, u_spec],
        out_specs=x_spec,
        out_shape=out_shape,
        compiler_params=cparams,
    )(x2, pe_s, u)
    return out2.reshape(S, B, D)


if __name__ == "__main__":
    # Small shapes consistent with the module's forward: (seq, batch, d_model).
    S, B, D = 8, 2, 128
    max_len = 100
    p = 0.1

    key = jax.random.PRNGKey(0)
    kx, kdrop = jax.random.split(key)
    x = jax.random.normal(kx, (S, B, D), dtype=jnp.float32)

    pe = make_positional_encoding(D, max_len=max_len)
    ref = x + pe[:S][:, None, :]

    # Eval-mode forward (dropout == identity): must match the reference.
    out_eval = jax.block_until_ready(
        positional_encoding_forward(x, pe, p=p, training=False))
    assert out_eval.shape == (S, B, D)
    assert jnp.allclose(out_eval, ref, atol=1e-6, rtol=1e-6), "eval mismatch"

    # Training-mode forward (dropout mask streamed from jax.random).
    out_train = jax.block_until_ready(
        positional_encoding_forward(x, pe, p=p, training=True, rng_key=kdrop))
    assert out_train.shape == (S, B, D)
    assert bool(jnp.all(jnp.isfinite(out_train)))
    # Every surviving element equals ref / (1 - p); dropped elements are 0.
    survived = out_train != 0.0
    assert jnp.allclose(
        jnp.where(survived, out_train, 0.0),
        jnp.where(survived, ref / (1.0 - p), 0.0),
        atol=1e-5, rtol=1e-5,
    ), "train-mode scaling mismatch"

    print("KERNEL_OK")
</pallas_src>

<mosaic_0001>
module attributes {stable_mosaic.version = 11 : i64} {
  func.func @_pe_add_kernel(%arg0: i32, %arg1: memref<8x256xf32, #tpu.memory_space<vmem>>, %arg2: memref<8x128xf32, #tpu.memory_space<vmem>>, %arg3: memref<8x256xf32, #tpu.memory_space<vmem>>) attributes {dimension_semantics = [#tpu.dimension_semantics<parallel>], iteration_bounds = array<i64: 1>, scalar_prefetch = 0 : i64, scratch_operands = 0 : i64, tpu.core_type = #tpu.core_type<tc>, window_params = [{transform_indices = @transform_0, window_bounds = array<i64: 8, 256>}, {transform_indices = @transform_1, window_bounds = array<i64: 8, 128>}, {transform_indices = @transform_2, window_bounds = array<i64: 8, 256>}]} {
    %c0 = arith.constant 0 : index
    %c0_0 = arith.constant 0 : index
    %0 = vector.load %arg2[%c0, %c0_0] : memref<8x128xf32, #tpu.memory_space<vmem>>, vector<8x128xf32>
    %c0_1 = arith.constant 0 : index
    %c0_2 = arith.constant 0 : index
    %1 = vector.load %arg1[%c0_1, %c0_2] : memref<8x256xf32, #tpu.memory_space<vmem>>, vector<8x128xf32>
    %2 = arith.addf %1, %0 : vector<8x128xf32>
    %c0_3 = arith.constant 0 : index
    %c0_4 = arith.constant 0 : index
    %3 = vector.load %arg3[%c0_3, %c0_4] : memref<8x256xf32, #tpu.memory_space<vmem>>, vector<8x128xf32>
    tpu.vector_store %arg3[%c0_3, %c0_4], %2 {strides = array<i32>} : memref<8x256xf32, #tpu.memory_space<vmem>>, vector<8x128xf32>,
    %c0_5 = arith.constant 0 : index
    %c128 = arith.constant 128 : index
    %4 = vector.load %arg1[%c0_5, %c128] : memref<8x256xf32, #tpu.memory_space<vmem>>, vector<8x128xf32>
    %5 = arith.addf %4, %0 : vector<8x128xf32>
    %c0_6 = arith.constant 0 : index
    %c128_7 = arith.constant 128 : index
    %6 = vector.load %arg3[%c0_6, %c128_7] : memref<8x256xf32, #tpu.memory_space<vmem>>, vector<8x128xf32>
    tpu.vector_store %arg3[%c0_6, %c128_7], %5 {strides = array<i32>} : memref<8x256xf32, #tpu.memory_space<vmem>>, vector<8x128xf32>,
    return
  }
  func.func @transform_0(%arg0: i32) -> (i32, i32) {
    %c0_i32 = arith.constant 0 : i32
    %c0_i32_0 = arith.constant 0 : i32
    return %arg0, %c0_i32 : i32, i32
  }
  func.func @transform_1(%arg0: i32) -> (i32, i32) {
    %c0_i32 = arith.constant 0 : i32
    %c0_i32_0 = arith.constant 0 : i32
    return %arg0, %c0_i32 : i32, i32
  }
  func.func @transform_2(%arg0: i32) -> (i32, i32) {
    %c0_i32 = arith.constant 0 : i32
    %c0_i32_0 = arith.constant 0 : i32
    return %arg0, %c0_i32 : i32, i32
  }
}

</mosaic_0001>

<bundles_post_ra>
// kernel: tpu_custom_call.1
= control target key start
LH: loop header
LB: loop body
LE: loop exit
PB: predicated region body
PF: predicated region fallthrough
CT: control target
= control target key end

     0   :  { %7 = vsyncpa [#allocation3], 0  ;;  %s188_s0 = inlined_call_operand.hbm [shape: f32[8,256], index: 0, kind: input, shape index: {}]   ;;  %s189_s1 = inlined_call_operand.hbm [shape: f32[8,128], index: 1, kind: input, shape index: {}]   ;;  %s190_s2 = inlined_call_operand.hbm [shape: f32[8,256], index: 2, kind: output, shape index: {}]  }
   0x1   :  { %8 = vsyncpa [#allocation6], 0 }
   0x2   :  { %9 = vsyncpa [#allocation4], 0  ;;  %s134_s9 = smov [#allocation2]   ;;  %s135_s11 = smov [#allocation5]  }
   0x3   :  { %s16_s10 = sshll.u32 %s134_s9, 4  ;;  %s26_s12 = sshll.u32 %s135_s11, 4  ;;  %s17_s10 = int_to_ptr.vmem [resolvable:$true] %s16_s10  ;;  %s27_s12 = int_to_ptr.vmem [resolvable:$true] %s26_s12 }
   0x4   :  { %s62_s15 = scalar_lea.hbm %s188_s0, 256 }
   0x5   :  { %p63_p0 = scmp.ne.s32.totalorder %s188_s0, %s62_s15  ;;  %p66_p1 = scmp.lt.u32.totalorder %s62_s15, %s188_s0 }
   0x7   :  { %p68_p2 = pnand %p66_p1, %p63_p0 }
   0x9   :  { %71 = shalt.err (!%p68_p2)
}
   0xa   :  { %s72_s20 = scalar_lea.vmem %s17_s10, 256  ;;  %p77_p4 = scmp.lt.s32.totalorder %s17_s10, %s17_s10 }
   0xb   :  { %p73_p3 = scmp.ne.s32.totalorder %s17_s10, %s72_s20  ;;  %p78_p5 = scmp.lt.s32.totalorder %s72_s20, %s72_s20 }
   0xd   :  { %p79_p6 = por %p78_p5, %p77_p4 }
   0xf   :  { %p80_p7 = pnand %p79_p6, %p73_p3 }
  0x11   :  { %83 = shalt.err (!%p80_p7)
}
  0x12   :  { %19 = dma.hbm_to_vmem [thread:$0]  %s188_s0, 256, %s17_s10, [#allocation3]  }
  0x13   :  { %s84_s25 = scalar_lea.hbm %s189_s1, 128 }
  0x14   :  { %p85_p8 = scmp.ne.s32.totalorder %s189_s1, %s84_s25  ;;  %p88_p9 = scmp.lt.u32.totalorder %s84_s25, %s189_s1 }
  0x16   :  { %p90_p10 = pnand %p88_p9, %p85_p8 }
  0x18   :  { %93 = shalt.err (!%p90_p10)
}
  0x19   :  { %s94_s30 = scalar_lea.vmem %s27_s12, 128  ;;  %p99_p12 = scmp.lt.s32.totalorder %s27_s12, %s27_s12 }
  0x1a   :  { %p95_p11 = scmp.ne.s32.totalorder %s27_s12, %s94_s30  ;;  %p100_p13 = scmp.lt.s32.totalorder %s94_s30, %s94_s30 }
  0x1c   :  { %p101_p0 = por %p100_p13, %p99_p12 }
  0x1e   :  { %p102_p1 = pnand %p101_p0, %p95_p11 }
  0x20   :  { %105 = shalt.err (!%p102_p1)
}
  0x21   :  { %29 = dma.hbm_to_vmem [thread:$0]  %s189_s1, 128, %s27_s12, [#allocation6]  }
  0x22   :  { %128 = dma.done.wait [#allocation3], 256  }
  0x23   :  { %129 = vsyncadd [#allocation3], 4294967040 }
  0x24   :  { %130 = dma.done.wait [#allocation6], 128  }
  0x25   :  { %131 = vsyncadd [#allocation6], 4294967168  ;;  %s136_s4 = smov [#allocation7]   ;;  %v36_v0 = vld [vmem:[#allocation5] sm:$0xff]  ;;  %v37_v1 = vld [vmem:[#allocation2] sm:$0xff] }
  0x26   :  { %s49_s5 = sshll.u32 %s136_s4, 4  ;;  %v40_v2 = vld [vmem:[#allocation2 + $0x8] sm:$0xff]  ;;  %v38_v3 = vadd.f32 %v37_v1, %v36_v0  ;;  %s50_s5 = int_to_ptr.vmem [resolvable:$true] %s49_s5 }
  0x27   :  { %v41_v4 = vadd.f32 %v40_v2, %v36_v0  ;;  %s106_s6 = scalar_lea.vmem %s50_s5, 256  ;;  %p111_p3 = scmp.lt.s32.totalorder %s50_s5, %s50_s5 }
  0x28   :  { %39 = vst [vmem:[#allocation7] sm:$0xff] %v38_v3  ;;  %p107_p2 = scmp.ne.s32.totalorder %s50_s5, %s106_s6  ;;  %p112_p4 = scmp.lt.s32.totalorder %s106_s6, %s106_s6 }
  0x29   :  { %42 = vst [vmem:[#allocation7 + $0x8] sm:$0xff] %v41_v4 }
  0x2a   :  { %p113_p5 = por %p112_p4, %p111_p3 }
  0x2c   :  { %p114_p6 = pnand %p113_p5, %p107_p2 }
  0x2e   :  { %117 = shalt.err (!%p114_p6)
}
  0x2f   :  { %s118_s8 = scalar_lea.hbm %s190_s2, 256 }
  0x30   :  { %p119_p7 = scmp.ne.s32.totalorder %s190_s2, %s118_s8  ;;  %p122_p8 = scmp.lt.u32.totalorder %s118_s8, %s190_s2 }
  0x32   :  { %p124_p9 = pnand %p122_p8, %p119_p7 }
  0x34   :  { %127 = shalt.err (!%p124_p9)
}
  0x35   :  { %52 = dma.vmem_to_hbm [thread:$0]  %s50_s5, 256, %s190_s2, [#allocation4]  }
  0x36   :  { %132 = dma.done.wait [#allocation4], 256  }
  0x37   :  { %133 = vsyncadd [#allocation4], 4294967040 }
  0x38   :  { %56 = vsyncpa [#allocation3], 1 }
  0x39   :  { %57 = vsyncpa [#allocation6], 1 }
  0x3a   :  { %58 = vsyncpa [#allocation4], 1 }

</bundles_post_ra>
